<compile_context>
chip_gen: v7x
topology: tpu7x:2x2x1
jax: 0.10.0
libtpu: 0.0.40
codegen_flags: <defaults>
</compile_context>

<pallas_src>
import math

import jax
import jax.numpy as jnp
from jax.experimental import pallas as pl
from jax.experimental.pallas import tpu as pltpu

# ---------------------------------------------------------------------------
# "config" stand-ins (module refers to a `config` object; pick small values)
# ---------------------------------------------------------------------------
SENSOR_FEATURE_SIZE = 32
OUTPUT_CLASSES = 4
HIDDEN_DIM1 = 128
HIDDEN_DIM2 = 64


# ---------------------------------------------------------------------------
# Pallas kernel: fused 4-layer MLP for one batch tile
# ---------------------------------------------------------------------------
def _welding_mlp_kernel(x_ref, w1_ref, b1_ref, w2_ref, b2_ref,
                        w3_ref, b3_ref, w4_ref, b4_ref, o_ref):
    # x is streamed as f32; cast to bf16 in-kernel (VPU has slack here).
    x = x_ref[...].astype(jnp.bfloat16)                        # (TB, F)

    # sensor_fc1 + ReLU (dropout == identity in eval); f32 accumulate/bias.
    h1 = jnp.dot(x, w1_ref[...], preferred_element_type=jnp.float32) + b1_ref[...]
    h1 = jnp.maximum(h1, 0.0).astype(jnp.bfloat16)

    # sensor_fc2 + ReLU
    h2 = jnp.dot(h1, w2_ref[...], preferred_element_type=jnp.float32) + b2_ref[...]
    h2 = jnp.maximum(h2, 0.0).astype(jnp.bfloat16)

    # fc_combined1 + ReLU
    h3 = jnp.dot(h2, w3_ref[...], preferred_element_type=jnp.float32) + b3_ref[...]
    h3 = jnp.maximum(h3, 0.0).astype(jnp.bfloat16)

    # output_layer (no activation); narrow (TB, C) masked store is cheap --
    # the vst slot is nowhere near saturated for this per-row compute.
    out = jnp.dot(h3, w4_ref[...], preferred_element_type=jnp.float32) + b4_ref[...]
    o_ref[...] = out.astype(o_ref.dtype)


# ---------------------------------------------------------------------------
# One-time parameter preparation (hoisted out of the per-call path)
# ---------------------------------------------------------------------------
def prepare_params(params):
    """Convert (W:(in,out) f32, b:(out,) f32) pairs to kernel layout:
    bf16 weights (in,out), f32 row biases (1,out)."""
    return tuple(
        (w.astype(jnp.bfloat16), b.reshape(1, -1).astype(jnp.float32))
        for (w, b) in params
    )


def welding_ai_model_forward(sensor_data, kernel_params, *, tile_batch=2048):
    """Fused Pallas forward.

    sensor_data: (B, F) float32.
    kernel_params: output of prepare_params().
    Returns (B, num_classes) float32 logits.
    """
    (w1, b1), (w2, b2), (w3, b3), (w4, b4) = kernel_params
    B, F = sensor_data.shape
    H1 = w1.shape[1]
    H2 = w2.shape[1]
    C = w4.shape[1]

    # Batch tile: multiple of 8 sublanes; partial last block handled by Pallas
    # (OOB input rows are undefined but rows are independent; OOB output rows
    # are masked -- never reduce across batch in-kernel).
    TB = tile_batch
    if B < TB:
        TB = max(8, ((B + 7) // 8) * 8)
    n_blocks = pl.cdiv(B, TB)

    # Weights/biases pinned in VMEM via constant index_map (DMA'd once).
    pinned = lambda a: pl.BlockSpec(a.shape, lambda i: (0,) * a.ndim)

    flops = 2 * B * (F * H1 + H1 * H2 + H2 * H2 + H2 * C)
    weight_bytes = 2 * (F * H1 + H1 * H2 + H2 * H2 + H2 * C) \
        + 4 * (H1 + H2 + H2 + C)
    bytes_accessed = B * (F * 4 + C * 4) + weight_bytes

    out = pl.pallas_call(
        _welding_mlp_kernel,
        out_shape=jax.ShapeDtypeStruct((B, C), jnp.float32),
        grid=(n_blocks,),
        in_specs=[
            pl.BlockSpec((TB, F), lambda i: (i, 0)),   # x: streamed per tile (f32)
            pinned(w1), pinned(b1),
            pinned(w2), pinned(b2),
            pinned(w3), pinned(b3),
            pinned(w4), pinned(b4),
        ],
        out_specs=pl.BlockSpec((TB, C), lambda i: (i, 0)),
        compiler_params=pltpu.CompilerParams(
            dimension_semantics=("parallel",)),
        cost_estimate=pl.CostEstimate(
            flops=flops, transcendentals=0, bytes_accessed=bytes_accessed),
    )(sensor_data, w1, b1, w2, b2, w3, b3, w4, b4)

    return out


# ---------------------------------------------------------------------------
# Deterministic parameter init (mimics nn.Linear default: U(-1/sqrt(fan_in), +))
# ---------------------------------------------------------------------------
def init_linear(key, fan_in, fan_out):
    kw, kb = jax.random.split(key)
    bound = 1.0 / math.sqrt(fan_in)
    # Stored as (in, out) so the kernel computes x @ W + b.
    w = jax.random.uniform(kw, (fan_in, fan_out), jnp.float32, -bound, bound)
    b = jax.random.uniform(kb, (fan_out,), jnp.float32, -bound, bound)
    return w, b


def init_params(key):
    k1, k2, k3, k4 = jax.random.split(key, 4)
    return (
        init_linear(k1, SENSOR_FEATURE_SIZE, HIDDEN_DIM1),   # sensor_fc1
        init_linear(k2, HIDDEN_DIM1, HIDDEN_DIM2),           # sensor_fc2
        init_linear(k3, HIDDEN_DIM2, HIDDEN_DIM2),           # fc_combined1
        init_linear(k4, HIDDEN_DIM2, OUTPUT_CLASSES),        # output_layer
    )


# ---------------------------------------------------------------------------
# Pure-JAX reference with identical dtype handling (bf16 matmuls, f32 accumulate)
# ---------------------------------------------------------------------------
def reference_forward(x, params):
    (w1, b1), (w2, b2), (w3, b3), (w4, b4) = params

    def layer(h, w, b, relu):
        y = jnp.dot(h.astype(jnp.bfloat16), w.astype(jnp.bfloat16),
                    preferred_element_type=jnp.float32) + b.astype(jnp.float32)
        return jnp.maximum(y, 0.0) if relu else y

    h = layer(x, w1, b1, True)
    h = layer(h, w2, b2, True)
    h = layer(h, w3, b3, True)
    return layer(h, w4, b4, False)


if __name__ == "__main__":
    key = jax.random.PRNGKey(0)
    k_params, k_data = jax.random.split(key)

    raw_params = init_params(k_params)
    kernel_params = prepare_params(raw_params)   # one-time weight prep

    batch = 2
    sensor_data = jax.random.normal(k_data, (batch, SENSOR_FEATURE_SIZE),
                                    dtype=jnp.float32)

    out = welding_ai_model_forward(sensor_data, kernel_params)
    out = jax.block_until_ready(out)

    ref = reference_forward(sensor_data, raw_params)
    assert out.shape == (batch, OUTPUT_CLASSES), out.shape
    assert jnp.allclose(out, ref, atol=2e-2, rtol=2e-2), "mismatch vs reference"

    print("KERNEL_OK")
</pallas_src>

<mosaic_0001>
module attributes {stable_mosaic.version = 11 : i64} {
  func.func @_welding_mlp_kernel(%arg0: i32, %arg1: memref<8x32xf32, #tpu.memory_space<vmem>>, %arg2: memref<32x128xbf16, #tpu.memory_space<vmem>>, %arg3: memref<1x128xf32, #tpu.memory_space<vmem>>, %arg4: memref<128x64xbf16, #tpu.memory_space<vmem>>, %arg5: memref<1x64xf32, #tpu.memory_space<vmem>>, %arg6: memref<64x64xbf16, #tpu.memory_space<vmem>>, %arg7: memref<1x64xf32, #tpu.memory_space<vmem>>, %arg8: memref<64x4xbf16, #tpu.memory_space<vmem>>, %arg9: memref<1x4xf32, #tpu.memory_space<vmem>>, %arg10: memref<8x4xf32, #tpu.memory_space<vmem>>) attributes {dimension_semantics = [#tpu.dimension_semantics<parallel>], iteration_bounds = array<i64: 1>, scalar_prefetch = 0 : i64, scratch_operands = 0 : i64, tpu.core_type = #tpu.core_type<tc>, window_params = [{transform_indices = @transform_0, window_bounds = array<i64: 8, 32>}, {pipeline_mode = #tpu.pipeline_mode<synchronous>, transform_indices = @transform_1, window_bounds = array<i64: 32, 128>}, {pipeline_mode = #tpu.pipeline_mode<synchronous>, transform_indices = @transform_2, window_bounds = array<i64: 1, 128>}, {pipeline_mode = #tpu.pipeline_mode<synchronous>, transform_indices = @transform_3, window_bounds = array<i64: 128, 64>}, {pipeline_mode = #tpu.pipeline_mode<synchronous>, transform_indices = @transform_4, window_bounds = array<i64: 1, 64>}, {pipeline_mode = #tpu.pipeline_mode<synchronous>, transform_indices = @transform_5, window_bounds = array<i64: 64, 64>}, {pipeline_mode = #tpu.pipeline_mode<synchronous>, transform_indices = @transform_6, window_bounds = array<i64: 1, 64>}, {pipeline_mode = #tpu.pipeline_mode<synchronous>, transform_indices = @transform_7, window_bounds = array<i64: 64, 4>}, {pipeline_mode = #tpu.pipeline_mode<synchronous>, transform_indices = @transform_8, window_bounds = array<i64: 1, 4>}, {transform_indices = @transform_9, window_bounds = array<i64: 8, 4>}]} {
    %c0 = arith.constant 0 : index
    %c0_0 = arith.constant 0 : index
    %0 = vector.load %arg1[%c0, %c0_0] : memref<8x32xf32, #tpu.memory_space<vmem>>, vector<8x32xf32>
    %1 = arith.truncf %0 : vector<8x32xf32> to vector<8x32xbf16>
    %c0_1 = arith.constant 0 : index
    %c0_2 = arith.constant 0 : index
    %2 = vector.load %arg2[%c0_1, %c0_2] : memref<32x128xbf16, #tpu.memory_space<vmem>>, vector<32x128xbf16>
    %cst = arith.constant dense<0.000000e+00> : vector<8x128xf32>
    %3 = tpu.matmul %1, %2, %cst {dimension_numbers = #tpu.dot_dimension_numbers<[1], [0], [0], [1], [0, 0, 1, 1], [], []>} : vector<8x32xbf16>, vector<32x128xbf16>, vector<8x128xf32> -> vector<8x128xf32>
    %c0_3 = arith.constant 0 : index
    %c0_4 = arith.constant 0 : index
    %4 = vector.load %arg3[%c0_3, %c0_4] : memref<1x128xf32, #tpu.memory_space<vmem>>, vector<1x128xf32>
    %5 = vector.broadcast %4 : vector<1x128xf32> to vector<8x128xf32>
    %6 = arith.addf %3, %5 : vector<8x128xf32>
    %cst_5 = arith.constant 0.000000e+00 : f32
    %7 = vector.broadcast %cst_5 : f32 to vector<8x128xf32>
    %8 = arith.maximumf %6, %7 : vector<8x128xf32>
    %9 = arith.truncf %8 : vector<8x128xf32> to vector<8x128xbf16>
    %c0_6 = arith.constant 0 : index
    %c0_7 = arith.constant 0 : index
    %10 = vector.load %arg4[%c0_6, %c0_7] : memref<128x64xbf16, #tpu.memory_space<vmem>>, vector<128x64xbf16>
    %cst_8 = arith.constant dense<0.000000e+00> : vector<8x64xf32>
    %11 = tpu.matmul %9, %10, %cst_8 {dimension_numbers = #tpu.dot_dimension_numbers<[1], [0], [0], [1], [0, 0, 1, 1], [], []>} : vector<8x128xbf16>, vector<128x64xbf16>, vector<8x64xf32> -> vector<8x64xf32>
    %c0_9 = arith.constant 0 : index
    %c0_10 = arith.constant 0 : index
    %12 = vector.load %arg5[%c0_9, %c0_10] : memref<1x64xf32, #tpu.memory_space<vmem>>, vector<1x64xf32>
    %13 = vector.broadcast %12 : vector<1x64xf32> to vector<8x64xf32>
    %14 = arith.addf %11, %13 : vector<8x64xf32>
    %cst_11 = arith.constant 0.000000e+00 : f32
    %15 = vector.broadcast %cst_11 : f32 to vector<8x64xf32>
    %16 = arith.maximumf %14, %15 : vector<8x64xf32>
    %17 = arith.truncf %16 : vector<8x64xf32> to vector<8x64xbf16>
    %c0_12 = arith.constant 0 : index
    %c0_13 = arith.constant 0 : index
    %18 = vector.load %arg6[%c0_12, %c0_13] : memref<64x64xbf16, #tpu.memory_space<vmem>>, vector<64x64xbf16>
    %cst_14 = arith.constant dense<0.000000e+00> : vector<8x64xf32>
    %19 = tpu.matmul %17, %18, %cst_14 {dimension_numbers = #tpu.dot_dimension_numbers<[1], [0], [0], [1], [0, 0, 1, 1], [], []>} : vector<8x64xbf16>, vector<64x64xbf16>, vector<8x64xf32> -> vector<8x64xf32>
    %c0_15 = arith.constant 0 : index
    %c0_16 = arith.constant 0 : index
    %20 = vector.load %arg7[%c0_15, %c0_16] : memref<1x64xf32, #tpu.memory_space<vmem>>, vector<1x64xf32>
    %21 = vector.broadcast %20 : vector<1x64xf32> to vector<8x64xf32>
    %22 = arith.addf %19, %21 : vector<8x64xf32>
    %cst_17 = arith.constant 0.000000e+00 : f32
    %23 = vector.broadcast %cst_17 : f32 to vector<8x64xf32>
    %24 = arith.maximumf %22, %23 : vector<8x64xf32>
    %25 = arith.truncf %24 : vector<8x64xf32> to vector<8x64xbf16>
    %c0_18 = arith.constant 0 : index
    %c0_19 = arith.constant 0 : index
    %26 = vector.load %arg8[%c0_18, %c0_19] : memref<64x4xbf16, #tpu.memory_space<vmem>>, vector<64x4xbf16>
    %cst_20 = arith.constant dense<0.000000e+00> : vector<8x4xf32>
    %27 = tpu.matmul %25, %26, %cst_20 {dimension_numbers = #tpu.dot_dimension_numbers<[1], [0], [0], [1], [0, 0, 1, 1], [], []>} : vector<8x64xbf16>, vector<64x4xbf16>, vector<8x4xf32> -> vector<8x4xf32>
    %c0_21 = arith.constant 0 : index
    %c0_22 = arith.constant 0 : index
    %28 = vector.load %arg9[%c0_21, %c0_22] : memref<1x4xf32, #tpu.memory_space<vmem>>, vector<1x4xf32>
    %29 = vector.broadcast %28 : vector<1x4xf32> to vector<8x4xf32>
    %30 = arith.addf %27, %29 : vector<8x4xf32>
    %c0_23 = arith.constant 0 : index
    %c0_24 = arith.constant 0 : index
    %31 = vector.load %arg10[%c0_23, %c0_24] : memref<8x4xf32, #tpu.memory_space<vmem>>, vector<8x4xf32>
    tpu.vector_store %arg10[%c0_23, %c0_24], %30 {strides = array<i32>} : memref<8x4xf32, #tpu.memory_space<vmem>>, vector<8x4xf32>,
    return
  }
  func.func @transform_0(%arg0: i32) -> (i32, i32) {
    %c0_i32 = arith.constant 0 : i32
    %c0_i32_0 = arith.constant 0 : i32
    return %arg0, %c0_i32 : i32, i32
  }
  func.func @transform_1(%arg0: i32) -> (i32, i32) {
    %c0_i32 = arith.constant 0 : i32
    %c0_i32_0 = arith.constant 0 : i32
    %c0_i32_1 = arith.constant 0 : i32
    return %c0_i32, %c0_i32_0 : i32, i32
  }
  func.func @transform_2(%arg0: i32) -> (i32, i32) {
    %c0_i32 = arith.constant 0 : i32
    %c0_i32_0 = arith.constant 0 : i32
    %c0_i32_1 = arith.constant 0 : i32
    return %c0_i32, %c0_i32_0 : i32, i32
  }
  func.func @transform_3(%arg0: i32) -> (i32, i32) {
    %c0_i32 = arith.constant 0 : i32
    %c0_i32_0 = arith.constant 0 : i32
    %c0_i32_1 = arith.constant 0 : i32
    return %c0_i32, %c0_i32_0 : i32, i32
  }
  func.func @transform_4(%arg0: i32) -> (i32, i32) {
    %c0_i32 = arith.constant 0 : i32
    %c0_i32_0 = arith.constant 0 : i32
    %c0_i32_1 = arith.constant 0 : i32
    return %c0_i32, %c0_i32_0 : i32, i32
  }
  func.func @transform_5(%arg0: i32) -> (i32, i32) {
    %c0_i32 = arith.constant 0 : i32
    %c0_i32_0 = arith.constant 0 : i32
    %c0_i32_1 = arith.constant 0 : i32
    return %c0_i32, %c0_i32_0 : i32, i32
  }
  func.func @transform_6(%arg0: i32) -> (i32, i32) {
    %c0_i32 = arith.constant 0 : i32
    %c0_i32_0 = arith.constant 0 : i32
    %c0_i32_1 = arith.constant 0 : i32
    return %c0_i32, %c0_i32_0 : i32, i32
  }
  func.func @transform_7(%arg0: i32) -> (i32, i32) {
    %c0_i32 = arith.constant 0 : i32
    %c0_i32_0 = arith.constant 0 : i32
    %c0_i32_1 = arith.constant 0 : i32
    return %c0_i32, %c0_i32_0 : i32, i32
  }
  func.func @transform_8(%arg0: i32) -> (i32, i32) {
    %c0_i32 = arith.constant 0 : i32
    %c0_i32_0 = arith.constant 0 : i32
    %c0_i32_1 = arith.constant 0 : i32
    return %c0_i32, %c0_i32_0 : i32, i32
  }
  func.func @transform_9(%arg0: i32) -> (i32, i32) {
    %c0_i32 = arith.constant 0 : i32
    %c0_i32_0 = arith.constant 0 : i32
    return %arg0, %c0_i32 : i32, i32
  }
}

</mosaic_0001>

<bundles_post_ra>
// kernel: tpu_custom_call.1
= control target key start
LH: loop header
LB: loop body
LE: loop exit
PB: predicated region body
PF: predicated region fallthrough
CT: control target
= control target key end

     0   :  { %14 = vsyncpa [#allocation3], 0  ;;  %v549_v1 = vmov 0.0   ;;  %vm550_vm0 = vmmov 0   ;;  %vm59_vm1 = vcmask 261120   ;;  %vm257_vm2 = vcmask 523264   ;;  %s713_s0 = inlined_call_operand.vmem [shape: f32[2,32], index: 0, kind: input, shape index: {}]   ;;  %s714_s1 = inlined_call_operand.vmem [shape: bf16[32,128], index: 1, kind: input, shape index: {}]   ;;  %s715_s2 = inlined_call_operand.vmem [shape: f32[1,128], index: 2, kind: input, shape index: {}]   ;;  %s716_s3 = inlined_call_operand.vmem [shape: bf16[128,64], index: 3, kind: input, shape index: {}]   ;;  %s717_s4 = inlined_call_operand.vmem [shape: f32[1,64], index: 4, kind: input, shape index: {}]   ;;  %s718_s5 = inlined_call_operand.vmem [shape: bf16[64,64], index: 5, kind: input, shape index: {}]   ;;  %s719_s6 = inlined_call_operand.vmem [shape: f32[1,64], index: 6, kind: input, shape index: {}]   ;;  %s720_s7 = inlined_call_operand.vmem [shape: bf16[64,4], index: 7, kind: input, shape index: {}]   ;;  %s721_s8 = inlined_call_operand.vmem [shape: f32[1,4], index: 8, kind: input, shape index: {}]   ;;  %s722_s9 = inlined_call_operand.hbm [shape: f32[2,4], index: 9, kind: output, shape index: {}]  }
   0x1   :  { %v507_v0 = vld [vmem:[%s714_s1] sm:$0xff]   ;;  %450 = vmatprep.subr.bf16.mxu0 %v549_v1  ;;  %458 = vmatprep.subr.bf16.mxu1 %v549_v1  ;;  %v508_v2 = vld [vmem:[%s714_s1 + $0x8] sm:$0xff]   ;;  %v511_v7 = vld [vmem:[%s716_s3 + $0x10] sm:$0xff]   ;;  %vm385_vm3 = vcmask 31744  }
   0x2   :  { %451 = vmatpush3.bf16.msra.mxu0 %v507_v0  ;;  %v34_v3 = vld [vmem:[%s713_s0] sm:$0xff]  ;;  %454 = vmatprep.mubr.msk.bf16.mxu0 %vm550_vm0, %v549_v1  ;;  %v510_v6 = vld [vmem:[%s716_s3 + $0x8] sm:$0xff]   ;;  %v512_v8 = vld [vmem:[%s716_s3 + $0x18] sm:$0xff]  }
   0x3   :  { %452 = vmatprep.subr.bf16.mxu0 %v549_v1  ;;  %v509_v4 = vld [vmem:[%s716_s3] sm:$0xff]   ;;  %474 = vmatprep.mubr.msk.bf16.mxu1 %vm550_vm0, %v549_v1  ;;  %v35_v5 = vpack.c.bf16 %v34_v3, %v34_v3  ;;  %v514_v10 = vld [vmem:[%s716_s3 + $0x28] sm:$0xff]   ;;  %v515_v11 = vld [vmem:[%s716_s3 + $0x30] sm:$0xff]  }
   0x4   :  { %459 = vmatpush3.bf16.msra.mxu1 %v509_v4  ;;  %v513_v9 = vld [vmem:[%s716_s3 + $0x20] sm:$0xff]   ;;  %v516_v12 = vld [vmem:[%s716_s3 + $0x38] sm:$0xff]   ;;  %v518_v14 = vld [vmem:[%s718_s5 + $0x8] sm:$0xff]  }
   0x5   :  { %460 = vmatprep.subr.bf16.mxu1 %v549_v1  ;;  %v517_v13 = vld [vmem:[%s718_s5] sm:$0xff]   ;;  %v519_v23 = vld [vmem:[%s718_s5 + $0x10] sm:$0xff]   ;;  %v520_v24 = vld [vmem:[%s718_s5 + $0x18] sm:$0xff]  }
   0x6   :  { %453 = vmatpush3.bf16.msra.mxu0 %v508_v2  ;;  %v403_v15 = vld [vmem:[%s715_s2] ss:$0 sm:$0xff]  ;;  %v522_v34 = vld [vmem:[%s720_s7 + $0x8] sm:$0xff]   ;;  %v523_v35 = vld [vmem:[%s720_s7 + $0x10] sm:$0xff]  }
   0x7   :  { %478 = vmatprep.subr.bf16.mxu0 %v549_v1  ;;  %v407_v25 = vld [vmem:[%s717_s4] ss:$0 sm:$0xff]  ;;  %v524_v36 = vld [vmem:[%s720_s7 + $0x18] sm:$0xff]  }
   0x8   :  { %461 = vmatpush3.bf16.msra.mxu1 %v510_v6  ;;  %v521_v32 = vld [vmem:[%s720_s7] sm:$0xff]  }
   0x9   :  { %455 = vmatmul.mubr.msk.bf16.vlgmr.msra.gmra.mrb[0].mxu0 %vm59_vm1, %v35_v5  ;;  %462 = vmatprep.subr.bf16.mxu1 %v549_v1  ;;  %v416_v37 = vld [vmem:[%s719_s6] ss:$0 sm:$0xff] }
   0xa   :  { %486 = vmatprep.mubr.msk.bf16.mxu0 %vm550_vm0, %v549_v1  ;;  %479 = vmatpush3.bf16.msra.mxu0 %v517_v13  ;;  %v422_v45 = vld [vmem:[%s721_s8] ss:$0 sm:$0xff] }
   0xb   :  { %480 = vmatprep.subr.bf16.mxu0 %v549_v1 }
   0xc   :  { %463 = vmatpush3.bf16.msra.mxu1 %v511_v7 }
   0xd   :  { %464 = vmatprep.subr.bf16.mxu1 %v549_v1 }
   0xe   :  { %481 = vmatpush3.bf16.msra.mxu0 %v518_v14 }
   0xf   :  { %482 = vmatprep.subr.bf16.mxu0 %v549_v1 }
  0x10   :  { %465 = vmatpush3.bf16.msra.mxu1 %v512_v8 }
  0x11   :  { %466 = vmatprep.subr.bf16.mxu1 %v549_v1 }
  0x12   :  { %483 = vmatpush3.bf16.msra.mxu0 %v519_v23 }
  0x13   :  { %484 = vmatprep.subr.bf16.mxu0 %v549_v1 }
  0x14   :  { %467 = vmatpush3.bf16.msra.mxu1 %v513_v9 }
  0x15   :  { %468 = vmatprep.subr.bf16.mxu1 %v549_v1 }
  0x16   :  { %485 = vmatpush3.bf16.msra.mxu0 %v520_v24 }
  0x17   :  { %490 = vmatprep.subr.bf16.mxu0 %v549_v1 }
  0x18   :  { %469 = vmatpush3.bf16.msra.mxu1 %v514_v10 }
  0x19   :  { %470 = vmatprep.subr.bf16.mxu1 %v549_v1 }
  0x1c   :  { %471 = vmatpush3.bf16.msra.mxu1 %v515_v11 }
  0x1d   :  { %472 = vmatprep.subr.bf16.mxu1 %v549_v1 }
  0x20   :  { %473 = vmatpush3.bf16.msra.mxu1 %v516_v12 }
  0xdc   :  { %v97_v16 = vpop.f32.mrb[0].mxu0 }
  0xdd   :  { %v98_v17 = vadd.f32 %v403_v15, %v97_v16  ;;  %v456_v18 = vpop.f32.mrb[1].mxu0 }
  0xde   :  { %v100_v19 = vpop.f32.mrb[2].mxu0 }
  0xdf   :  { %v103_v20 = vmax.f32 %v98_v17, 0.0  ;;  %v457_v21 = vpop.f32.mrb[3].mxu0 }
  0xe1   :  { %v104_v22 = vpack.c.bf16 %v103_v20, %v103_v20 }
  0xe3   :  { %475 = vmatmul.mubr.bf16.vlgmr.msra.gmra.mrb[0].mxu1 %v104_v22 }
 0x1b6   :  { %v210_v26 = vpop.f32.mrb[0].mxu1 }
 0x1b7   :  { %v211_v27 = vadd.f32 %v407_v25, %v210_v26  ;;  %v476_v28 = vpop.f32.mrb[1].mxu1 }
 0x1b8   :  { %v213_v29 = vpop.f32.mrb[2].mxu1 }
 0x1b9   :  { %v216_v30 = vmax.f32 %v211_v27, 0.0  ;;  %v477_v31 = vpop.f32.mrb[3].mxu1 }
 0x1bb   :  { %v217_v33 = vpack.c.bf16 %v216_v30, %v216_v30 }
 0x1bd   :  { %487 = vmatmul.mubr.msk.bf16.vlgmr.msra.gmra.mrb[4].mxu0 %vm257_vm2, %v217_v33 }
 0x1be   :  { %491 = vmatpush3.bf16.msra.mxu0 %v521_v32  ;;  %498 = vmatprep.mubr.msk.bf16.mxu0 %vm550_vm0, %v549_v1 }
 0x1bf   :  { %492 = vmatprep.subr.bf16.mxu0 %v549_v1 }
 0x1c2   :  { %493 = vmatpush3.bf16.msra.mxu0 %v522_v34 }
 0x1c3   :  { %494 = vmatprep.subr.bf16.mxu0 %v549_v1 }
 0x1c6   :  { %495 = vmatpush3.bf16.msra.mxu0 %v523_v35 }
 0x1c7   :  { %496 = vmatprep.subr.bf16.mxu0 %v549_v1 }
 0x1ca   :  { %497 = vmatpush3.bf16.msra.mxu0 %v524_v36 }
 0x290   :  { %v295_v38 = vpop.f32.mrb[4].mxu0 }
 0x291   :  { %v296_v39 = vadd.f32 %v416_v37, %v295_v38  ;;  %v488_v40 = vpop.f32.mrb[5].mxu0 }
 0x292   :  { %v298_v41 = vpop.f32.mrb[6].mxu0 }
 0x293   :  { %v301_v42 = vmax.f32 %v296_v39, 0.0  ;;  %v489_v43 = vpop.f32.mrb[7].mxu0 }
 0x295   :  { %v302_v44 = vpack.c.bf16 %v301_v42, %v301_v42 }
 0x297   :  { %499 = vmatmul.mubr.msk.bf16.vlgmr.msra.gmra.mrb[8].mxu0 %vm257_vm2, %v302_v44 }
 0x36a   :  { %v379_v46 = vpop.f32.mrb[8].mxu0 }
 0x36b   :  { %v380_v47 = vadd.f32 %v422_v45, %v379_v46  ;;  %v500_v48 = vpop.f32.mrb[9].mxu0 }
 0x36c   :  { %v382_v49 = vpop.f32.mrb[10].mxu0 }
 0x36d   :  { %386 = vst.msk [vmem:[#allocation2] sm:$0xff] %vm385_vm3, %v380_v47  ;;  %v501_v50 = vpop.f32.mrb[11].mxu0 }
 0x36e   :  { %391 = vsyncadd [#allocation3], 96  ;;  %s551_s6 = smov [#allocation2]  }
 0x36f   :  { %s392_s7 = sshll.u32 %s551_s6, 4  ;;  %s393_s7 = int_to_ptr.vmem [resolvable:$true] %s392_s7 }
 0x370   :  { %s525_s26 = scalar_lea.vmem %s393_s7, 32  ;;  %s529_s27 = scalar_lea.vmem %s393_s7, 128 }
 0x371   :  { %p526_p0 = scmp.ne.s32.totalorder %s393_s7, %s525_s26  ;;  %p530_p1 = scmp.lt.s32.totalorder %s393_s7, %s393_s7 }
 0x372   :  { %p531_p2 = scmp.lt.s32.totalorder %s529_s27, %s525_s26 }
 0x374   :  { %p532_p3 = por %p531_p2, %p530_p1 }
 0x376   :  { %p533_p4 = pnand %p532_p3, %p526_p0 }
 0x378   :  { %536 = shalt.err (!%p533_p4)
}
 0x379   :  { %s537_s29 = scalar_lea.hbm %s722_s9, 32 }
 0x37a   :  { %p538_p5 = scmp.ne.s32.totalorder %s722_s9, %s537_s29  ;;  %p541_p6 = scmp.lt.u32.totalorder %s537_s29, %s722_s9 }
 0x37c   :  { %p543_p7 = pnand %p541_p6, %p538_p5 }
 0x37e   :  { %546 = shalt.err (!%p543_p7)
}
 0x37f   :  { %s552_s13 = smov 32   ;;  %s553_s3 = smov 2  }
 0x380   :  { %398 = dma.vmem_to_hbm [thread:$0]  %s393_s7, 32, %s722_s9, [#allocation3], %s552_s13, %s552_s13, %s553_s3  }
 0x381   :  { %547 = dma.done.wait [#allocation3], 128  }
 0x382   :  { %548 = vsyncadd [#allocation3], 4294967168 }
 0x383   :  { %402 = vsyncpa [#allocation3], 1 }

</bundles_post_ra>
